<compile_context>
chip_gen: v6e
topology: v6e:2x2x1
jax: 0.10.0
libtpu: 0.0.40
codegen_flags: <defaults>
</compile_context>

<pallas_src>
import functools
import math

import jax
import jax.numpy as jnp
import numpy as np
from jax import lax
from jax.experimental import pallas as pl
from jax.experimental.pallas import tpu as pltpu

# ---- globals used by the PyTorch module (chosen small & consistent) ----
batch_sz = 2
L = 4
H = 32
W = 32
len_of_lookup = 7
train_sz = 100

Dk = 256                      # fixed by the module
Dv = 4 * len_of_lookup + 4    # = 32
h, w = H // 8, W // 8         # 4, 4
M = h * w                     # pixels per image, folded into the matmul M dim
ALPHA = 0.0                   # self.alpha = 0 in the module
# exact precedence of the PyTorch scale expression:
SCALE = math.log(L * H // 8 * W // 8 + H // 8 * W // 8, train_sz) / math.sqrt(Dk)


# ----------------------------------------------------------------------------
# kernels (alpha and the write slot are trace-time Python constants)
# ----------------------------------------------------------------------------
def _update_only_kernel(fc_ref, fm_ref, kw_ref, vw_ref, _kin_ref, _vin_ref,
                        kout_ref, vout_ref):
    """alpha == 0: only the K/V projections + rotating-slot write survive.
    _kin_ref/_vin_ref are never read; they exist only so the outputs can alias
    the persistent buffers in place."""
    B = fc_ref.shape[0]
    fc2 = fc_ref[...].reshape(B * M, Dk)                       # (B*M, Dk)
    fm2 = fm_ref[...].reshape(B * M, Dv)                       # (B*M, Dv)
    new_k = jnp.dot(fc2, kw_ref[...], preferred_element_type=jnp.float32)
    new_v = jnp.dot(fm2, vw_ref[...], preferred_element_type=jnp.float32)
    kout_ref[...] = new_k.reshape(B, M, Dk)
    vout_ref[...] = new_v.reshape(B, M, Dv)


def _make_attn_kernel(alpha, slot):
    def kernel(fc_ref, fm_ref, qw_ref, kw_ref, vw_ref, kin_ref, vin_ref,
               fam_ref, kout_ref, vout_ref):
        B = fc_ref.shape[0]
        fc2 = fc_ref[...].reshape(B * M, Dk)                   # (B*M, Dk)
        fm2 = fm_ref[...].reshape(B * M, Dv)                   # (B*M, Dv)

        # projections: B folded into the matmul row dimension (one RHS push each)
        q     = jnp.dot(fc2, qw_ref[...], preferred_element_type=jnp.float32)
        new_k = jnp.dot(fc2, kw_ref[...], preferred_element_type=jnp.float32)
        new_v = jnp.dot(fm2, vw_ref[...], preferred_element_type=jnp.float32)

        # rotating-slot write: only this slot is DMA'd back to HBM; the other
        # L-1 slots stay untouched via input_output_aliases.
        kout_ref[...] = new_k.reshape(B, M, Dk)
        vout_ref[...] = new_v.reshape(B, M, Dv)

        # effective memory = old buffer with `slot` replaced by the new
        # projections, built register-side from the INPUT refs (no
        # store->load dependency on the output refs).
        kin = kin_ref[...]                                     # (B, L, M, Dk)
        vin = vin_ref[...]                                     # (B, L, M, Dv)
        slot_mask = (lax.broadcasted_iota(jnp.int32, (B, L, M, 1), 1) == slot)
        k_eff = jnp.where(slot_mask, new_k.reshape(B, 1, M, Dk), kin)
        v_eff = jnp.where(slot_mask, new_v.reshape(B, 1, M, Dv), vin)

        # scores[b, l, m] = SCALE * <q[b, m], k_eff[b, l, m]>
        q4 = q.reshape(B, 1, M, Dk)
        s = jnp.sum(q4 * k_eff, axis=-1) * SCALE               # (B, L, M)

        # softmax over the width axis (pixel m = hh*w + ww, so groups are the
        # consecutive runs of w lanes):  attn_i = 1 / sum_{j in grp} exp(s_j - s_i).
        # Identical to the per-group max-shifted softmax, denom >= 1 always.
        s_i = s[..., :, None]                                  # (B, L, M, 1)
        s_j = s[..., None, :]                                  # (B, L, 1, M)
        gi = lax.broadcasted_iota(jnp.int32, (M, M), 0) // w
        gj = lax.broadcasted_iota(jnp.int32, (M, M), 1) // w
        e = jnp.where(gi == gj, jnp.exp(s_j - s_i), 0.0)       # (B, L, M, M)
        attn = 1.0 / jnp.sum(e, axis=-1, keepdims=True)        # (B, L, M, 1)

        # read-out over the L memory slots
        out = jnp.sum(attn * v_eff, axis=1)                    # (B, M, Dv)
        fam_ref[...] = (fm_ref[...] + alpha * out).astype(fam_ref.dtype)
    return kernel


# ----------------------------------------------------------------------------
# flat channels-last entry point (recommended persistent layout)
#   fc_flat (B, M, Dk), fm_flat (B, M, Dv)           pixel index m = hh*w + ww
#   kbuf_flat (B, L, M, Dk), vbuf_flat (B, L, M, Dv)  circular-slot buffers
# ----------------------------------------------------------------------------
@functools.partial(jax.jit, static_argnames=("slot", "alpha"))
def mem_attention_forward_flat(fc_flat, fm_flat, Qw, Kw, Vw,
                               kbuf_flat, vbuf_flat, *, slot, alpha=ALPHA):
    """One MemAttention step.  `slot` (static int in [0, L)) is the slot that
    holds the oldest entry; it is overwritten with this step's projections.
    Callers advance slot = (slot + 1) % L between calls, and should donate
    kbuf_flat/vbuf_flat for truly in-place slot writes.
    Returns (fam_flat, new kbuf_flat, new vbuf_flat)."""
    B = fc_flat.shape[0]
    slot = int(slot)
    alpha = float(alpha)

    act_specs = [
        pl.BlockSpec((B, M, Dk), lambda i: (0, 0, 0)),         # fc
        pl.BlockSpec((B, M, Dv), lambda i: (0, 0, 0)),         # fm
    ]
    w256_spec = pl.BlockSpec((Dk, Dk), lambda i: (0, 0))       # Q / K weights
    w32_spec = pl.BlockSpec((Dv, Dv), lambda i: (0, 0))        # V weight
    kslot_spec = pl.BlockSpec((B, None, M, Dk), lambda i: (0, slot, 0, 0))
    vslot_spec = pl.BlockSpec((B, None, M, Dv), lambda i: (0, slot, 0, 0))
    kfull_spec = pl.BlockSpec((B, L, M, Dk), lambda i: (0, 0, 0, 0))
    vfull_spec = pl.BlockSpec((B, L, M, Dv), lambda i: (0, 0, 0, 0))

    buf_shapes = (jax.ShapeDtypeStruct((B, L, M, Dk), jnp.float32),
                  jax.ShapeDtypeStruct((B, L, M, Dv), jnp.float32))

    if alpha == 0.0:
        # Attention read-out is dead code: project, write the two slots, done.
        # (Reference computes fm + 0 * out; identical unless out is NaN/Inf.)
        kbuf_new, vbuf_new = pl.pallas_call(
            _update_only_kernel,
            grid=(1,),
            in_specs=act_specs + [w256_spec, w32_spec, kslot_spec, vslot_spec],
            out_specs=(kslot_spec, vslot_spec),
            out_shape=buf_shapes,
            input_output_aliases={4: 0, 5: 1},                 # kbuf, vbuf in place
            compiler_params=pltpu.CompilerParams(
                dimension_semantics=("arbitrary",)),
        )(fc_flat, fm_flat, Kw, Vw, kbuf_flat, vbuf_flat)
        return fm_flat, kbuf_new, vbuf_new

    fam, kbuf_new, vbuf_new = pl.pallas_call(
        _make_attn_kernel(alpha, slot),
        grid=(1,),
        in_specs=act_specs + [w256_spec, w256_spec, w32_spec,
                              kfull_spec, vfull_spec],
        out_specs=(pl.BlockSpec((B, M, Dv), lambda i: (0, 0, 0)),
                   kslot_spec, vslot_spec),
        out_shape=(jax.ShapeDtypeStruct((B, M, Dv), jnp.float32),) + buf_shapes,
        input_output_aliases={5: 1, 6: 2},                     # kbuf, vbuf in place
        compiler_params=pltpu.CompilerParams(
            dimension_semantics=("arbitrary",)),
    )(fc_flat, fm_flat, Qw, Kw, Vw, kbuf_flat, vbuf_flat)
    return fam, kbuf_new, vbuf_new


# ----------------------------------------------------------------------------
# NCHW activation adapter (only the small fc/fm/fam are transposed per call;
# the persistent K/V buffers stay in the flat circular layout end-to-end).
# ----------------------------------------------------------------------------
def mem_attention_forward(fc_nchw, fm_nchw, Qw, Kw, Vw,
                          kbuf_flat, vbuf_flat, *, slot, alpha=ALPHA):
    B = fc_nchw.shape[0]
    fc_flat = jnp.transpose(fc_nchw, (0, 2, 3, 1)).reshape(B, M, Dk)
    fm_flat = jnp.transpose(fm_nchw, (0, 2, 3, 1)).reshape(B, M, Dv)
    fam_flat, kb, vb = mem_attention_forward_flat(
        fc_flat, fm_flat, Qw, Kw, Vw, kbuf_flat, vbuf_flat,
        slot=slot, alpha=alpha)
    fam = jnp.transpose(fam_flat.reshape(B, h, w, Dv), (0, 3, 1, 2))
    return fam, kb, vb


# ----- layout helpers (boundary / test only, never on the per-call hot path) --
def buffer_nchw_to_flat(buf):
    """(B, L, C, h, w) -> (B, L, h*w, C)."""
    B_, L_, C = buf.shape[0], buf.shape[1], buf.shape[2]
    return jnp.transpose(buf, (0, 1, 3, 4, 2)).reshape(B_, L_, M, C)


def buffer_flat_to_nchw(buf):
    """(B, L, h*w, C) -> (B, L, C, h, w)."""
    B_, L_, _, C = buf.shape
    return jnp.transpose(buf.reshape(B_, L_, h, w, C), (0, 1, 4, 2, 3))


def circular_to_logical(buf, slot):
    """Rotate a circular buffer (with `slot` just written) to oldest-first order."""
    return jnp.roll(buf, shift=-(slot + 1), axis=1)


# ----------------------------------------------------------------------------
# pure-JAX reference (mirrors the PyTorch forward exactly, NCHW + shift)
# ----------------------------------------------------------------------------
def ref_forward(fc, fm, Qw, Kw, Vw, key_buffer, value_buffer, alpha=ALPHA):
    matmul = lambda a, b: jnp.einsum('ijkl,jm->imkl', a, b)
    q = matmul(fc, Qw)
    new_kbuf = jnp.concatenate([key_buffer[:, 1:], matmul(fc, Kw)[:, None]], axis=1)
    new_vbuf = jnp.concatenate([value_buffer[:, 1:], matmul(fm, Vw)[:, None]], axis=1)
    scores = SCALE * jnp.einsum('ijkl,imjkl->imkl', q, new_kbuf)
    attn = jax.nn.softmax(scores, axis=-1)
    out = jnp.einsum('imkl,imnkl->inkl', attn, new_vbuf)
    return fm + alpha * out, new_kbuf, new_vbuf


def xavier_uniform(key, shape):
    bound = math.sqrt(6.0 / (shape[0] + shape[1]))
    return jax.random.uniform(key, shape, jnp.float32, -bound, bound)


if __name__ == "__main__":
    keys = jax.random.split(jax.random.PRNGKey(0), 9)
    fc1 = jax.random.normal(keys[0], (batch_sz, Dk, h, w), jnp.float32)
    fm1 = jax.random.normal(keys[1], (batch_sz, Dv, h, w), jnp.float32)
    fc2 = jax.random.normal(keys[2], (batch_sz, Dk, h, w), jnp.float32)
    fm2 = jax.random.normal(keys[3], (batch_sz, Dv, h, w), jnp.float32)
    Qw = xavier_uniform(keys[4], (Dk, Dk))
    Kw = xavier_uniform(keys[5], (Dk, Dk))
    Vw = xavier_uniform(keys[6], (Dv, Dv))
    tol = dict(rtol=1e-4, atol=1e-4)

    # --- case 1: module default (alpha = 0), zero-initialised memory ----------
    kbuf0 = jnp.zeros((batch_sz, L, Dk, h, w), jnp.float32)
    vbuf0 = jnp.zeros((batch_sz, L, Dv, h, w), jnp.float32)
    r_fam, r_kb, r_vb = ref_forward(fc1, fm1, Qw, Kw, Vw, kbuf0, vbuf0, alpha=0.0)
    fam, kb_c, vb_c = jax.block_until_ready(
        mem_attention_forward(fc1, fm1, Qw, Kw, Vw,
                              buffer_nchw_to_flat(kbuf0),
                              buffer_nchw_to_flat(vbuf0),
                              slot=0, alpha=0.0))
    np.testing.assert_allclose(np.asarray(fam), np.asarray(r_fam), **tol)
    np.testing.assert_allclose(
        np.asarray(buffer_flat_to_nchw(circular_to_logical(kb_c, 0))),
        np.asarray(r_kb), **tol)
    np.testing.assert_allclose(
        np.asarray(buffer_flat_to_nchw(circular_to_logical(vb_c, 0))),
        np.asarray(r_vb), **tol)

    # --- case 2: alpha != 0, nonzero memory, two chained steps (slot rotation) -
    kbuf1 = jax.random.normal(keys[7], (batch_sz, L, Dk, h, w), jnp.float32)
    vbuf1 = jax.random.normal(keys[8], (batch_sz, L, Dv, h, w), jnp.float32)
    r_fam1, r_kb1, r_vb1 = ref_forward(fc1, fm1, Qw, Kw, Vw, kbuf1, vbuf1, alpha=0.5)
    r_fam2, r_kb2, r_vb2 = ref_forward(fc2, fm2, Qw, Kw, Vw, r_kb1, r_vb1, alpha=0.5)

    k_fam1, kb_c, vb_c = mem_attention_forward(
        fc1, fm1, Qw, Kw, Vw,
        buffer_nchw_to_flat(kbuf1), buffer_nchw_to_flat(vbuf1),
        slot=0, alpha=0.5)
    k_fam2, kb_c, vb_c = jax.block_until_ready(
        mem_attention_forward(fc2, fm2, Qw, Kw, Vw, kb_c, vb_c,
                              slot=1, alpha=0.5))
    np.testing.assert_allclose(np.asarray(k_fam1), np.asarray(r_fam1), **tol)
    np.testing.assert_allclose(np.asarray(k_fam2), np.asarray(r_fam2), **tol)
    np.testing.assert_allclose(
        np.asarray(buffer_flat_to_nchw(circular_to_logical(kb_c, 1))),
        np.asarray(r_kb2), **tol)
    np.testing.assert_allclose(
        np.asarray(buffer_flat_to_nchw(circular_to_logical(vb_c, 1))),
        np.asarray(r_vb2), **tol)

    print("KERNEL_OK")
</pallas_src>

<mosaic_0001>
module attributes {stable_mosaic.version = 11 : i64} {
  func.func @_update_only_kernel(%arg0: i32, %arg1: memref<2x16x256xf32, #tpu.memory_space<vmem>>, %arg2: memref<2x16x32xf32, #tpu.memory_space<vmem>>, %arg3: memref<256x256xf32, #tpu.memory_space<vmem>>, %arg4: memref<32x32xf32, #tpu.memory_space<vmem>>, %arg5: memref<2x1x16x256xf32, #tpu.memory_space<vmem>>, %arg6: memref<2x1x16x32xf32, #tpu.memory_space<vmem>>, %arg7: memref<2x1x16x256xf32, #tpu.memory_space<vmem>>, %arg8: memref<2x1x16x32xf32, #tpu.memory_space<vmem>>) attributes {dimension_semantics = [#tpu.dimension_semantics<arbitrary>], iteration_bounds = array<i64: 1>, scalar_prefetch = 0 : i64, scratch_operands = 0 : i64, tpu.core_type = #tpu.core_type<tc>, window_params = [{pipeline_mode = #tpu.pipeline_mode<synchronous>, transform_indices = @transform_0, window_bounds = array<i64: 2, 16, 256>}, {pipeline_mode = #tpu.pipeline_mode<synchronous>, transform_indices = @transform_1, window_bounds = array<i64: 2, 16, 32>}, {pipeline_mode = #tpu.pipeline_mode<synchronous>, transform_indices = @transform_2, window_bounds = array<i64: 256, 256>}, {pipeline_mode = #tpu.pipeline_mode<synchronous>, transform_indices = @transform_3, window_bounds = array<i64: 32, 32>}, {transform_indices = @transform_4, window_bounds = array<i64: 2, 1, 16, 256>}, {transform_indices = @transform_5, window_bounds = array<i64: 2, 1, 16, 32>}, {transform_indices = @transform_6, window_bounds = array<i64: 2, 1, 16, 256>}, {transform_indices = @transform_7, window_bounds = array<i64: 2, 1, 16, 32>}]} {
    %c0 = arith.constant 0 : index
    %c0_0 = arith.constant 0 : index
    %c0_1 = arith.constant 0 : index
    %0 = vector.load %arg1[%c0, %c0_0, %c0_1] : memref<2x16x256xf32, #tpu.memory_space<vmem>>, vector<2x16x256xf32>
    %1 = vector.shape_cast %0 : vector<2x16x256xf32> to vector<32x256xf32>
    %c0_2 = arith.constant 0 : index
    %c0_3 = arith.constant 0 : index
    %c0_4 = arith.constant 0 : index
    %2 = vector.load %arg2[%c0_2, %c0_3, %c0_4] : memref<2x16x32xf32, #tpu.memory_space<vmem>>, vector<2x16x32xf32>
    %3 = vector.shape_cast %2 : vector<2x16x32xf32> to vector<32x32xf32>
    %c0_5 = arith.constant 0 : index
    %c0_6 = arith.constant 0 : index
    %4 = vector.load %arg3[%c0_5, %c0_6] : memref<256x256xf32, #tpu.memory_space<vmem>>, vector<256x256xf32>
    %cst = arith.constant dense<0.000000e+00> : vector<32x256xf32>
    %5 = tpu.matmul %1, %4, %cst {dimension_numbers = #tpu.dot_dimension_numbers<[1], [0], [0], [1], [0, 0, 1, 1], [], []>} : vector<32x256xf32>, vector<256x256xf32>, vector<32x256xf32> -> vector<32x256xf32>
    %c0_7 = arith.constant 0 : index
    %c0_8 = arith.constant 0 : index
    %6 = vector.load %arg4[%c0_7, %c0_8] : memref<32x32xf32, #tpu.memory_space<vmem>>, vector<32x32xf32>
    %cst_9 = arith.constant dense<0.000000e+00> : vector<32x32xf32>
    %7 = tpu.matmul %3, %6, %cst_9 {dimension_numbers = #tpu.dot_dimension_numbers<[1], [0], [0], [1], [0, 0, 1, 1], [], []>} : vector<32x32xf32>, vector<32x32xf32>, vector<32x32xf32> -> vector<32x32xf32>
    %8 = vector.shape_cast %5 : vector<32x256xf32> to vector<2x16x256xf32>
    %c0_10 = arith.constant 0 : index
    %c0_11 = arith.constant 0 : index
    %c0_12 = arith.constant 0 : index
    %c0_13 = arith.constant 0 : index
    %9 = vector.load %arg7[%c0_10, %c0_11, %c0_12, %c0_13] : memref<2x1x16x256xf32, #tpu.memory_space<vmem>>, vector<2x1x16x256xf32>
    %10 = vector.shape_cast %9 : vector<2x1x16x256xf32> to vector<2x16x256xf32>
    %11 = vector.shape_cast %8 : vector<2x16x256xf32> to vector<2x1x16x256xf32>
    tpu.vector_store %arg7[%c0_10, %c0_11, %c0_12, %c0_13], %11 {strides = array<i32>} : memref<2x1x16x256xf32, #tpu.memory_space<vmem>>, vector<2x1x16x256xf32>,
    %12 = vector.shape_cast %7 : vector<32x32xf32> to vector<2x16x32xf32>
    %c0_14 = arith.constant 0 : index
    %c0_15 = arith.constant 0 : index
    %c0_16 = arith.constant 0 : index
    %c0_17 = arith.constant 0 : index
    %13 = vector.load %arg8[%c0_14, %c0_15, %c0_16, %c0_17] : memref<2x1x16x32xf32, #tpu.memory_space<vmem>>, vector<2x1x16x32xf32>
    %14 = vector.shape_cast %13 : vector<2x1x16x32xf32> to vector<2x16x32xf32>
    %15 = vector.shape_cast %12 : vector<2x16x32xf32> to vector<2x1x16x32xf32>
    tpu.vector_store %arg8[%c0_14, %c0_15, %c0_16, %c0_17], %15 {strides = array<i32>} : memref<2x1x16x32xf32, #tpu.memory_space<vmem>>, vector<2x1x16x32xf32>,
    return
  }
  func.func @transform_0(%arg0: i32) -> (i32, i32, i32) {
    %c0_i32 = arith.constant 0 : i32
    %c0_i32_0 = arith.constant 0 : i32
    %c0_i32_1 = arith.constant 0 : i32
    %c0_i32_2 = arith.constant 0 : i32
    return %c0_i32, %c0_i32_0, %c0_i32_1 : i32, i32, i32
  }
  func.func @transform_1(%arg0: i32) -> (i32, i32, i32) {
    %c0_i32 = arith.constant 0 : i32
    %c0_i32_0 = arith.constant 0 : i32
    %c0_i32_1 = arith.constant 0 : i32
    %c0_i32_2 = arith.constant 0 : i32
    return %c0_i32, %c0_i32_0, %c0_i32_1 : i32, i32, i32
  }
  func.func @transform_2(%arg0: i32) -> (i32, i32) {
    %c0_i32 = arith.constant 0 : i32
    %c0_i32_0 = arith.constant 0 : i32
    %c0_i32_1 = arith.constant 0 : i32
    return %c0_i32, %c0_i32_0 : i32, i32
  }
  func.func @transform_3(%arg0: i32) -> (i32, i32) {
    %c0_i32 = arith.constant 0 : i32
    %c0_i32_0 = arith.constant 0 : i32
    %c0_i32_1 = arith.constant 0 : i32
    return %c0_i32, %c0_i32_0 : i32, i32
  }
  func.func @transform_4(%arg0: i32) -> (i32, i32, i32, i32) {
    %c0_i32 = arith.constant 0 : i32
    %c0_i32_0 = arith.constant 0 : i32
    %c0_i32_1 = arith.constant 0 : i32
    %c0_i32_2 = arith.constant 0 : i32
    %c0_i32_3 = arith.constant 0 : i32
    return %c0_i32, %c0_i32_0, %c0_i32_1, %c0_i32_2 : i32, i32, i32, i32
  }
  func.func @transform_5(%arg0: i32) -> (i32, i32, i32, i32) {
    %c0_i32 = arith.constant 0 : i32
    %c0_i32_0 = arith.constant 0 : i32
    %c0_i32_1 = arith.constant 0 : i32
    %c0_i32_2 = arith.constant 0 : i32
    %c0_i32_3 = arith.constant 0 : i32
    return %c0_i32, %c0_i32_0, %c0_i32_1, %c0_i32_2 : i32, i32, i32, i32
  }
  func.func @transform_6(%arg0: i32) -> (i32, i32, i32, i32) {
    %c0_i32 = arith.constant 0 : i32
    %c0_i32_0 = arith.constant 0 : i32
    %c0_i32_1 = arith.constant 0 : i32
    %c0_i32_2 = arith.constant 0 : i32
    %c0_i32_3 = arith.constant 0 : i32
    return %c0_i32, %c0_i32_0, %c0_i32_1, %c0_i32_2 : i32, i32, i32, i32
  }
  func.func @transform_7(%arg0: i32) -> (i32, i32, i32, i32) {
    %c0_i32 = arith.constant 0 : i32
    %c0_i32_0 = arith.constant 0 : i32
    %c0_i32_1 = arith.constant 0 : i32
    %c0_i32_2 = arith.constant 0 : i32
    %c0_i32_3 = arith.constant 0 : i32
    return %c0_i32, %c0_i32_0, %c0_i32_1, %c0_i32_2 : i32, i32, i32, i32
  }
}

</mosaic_0001>

<bundles_post_ra>
// kernel: mem_attention_forward_flat.1
= control target key start
LH: loop header
LB: loop body
LE: loop exit
PB: predicated region body
PF: predicated region fallthrough
CT: control target
= control target key end

     0   :  { %13 = vsyncpa [#allocation3], 0  ;;  %s550_s24 = smov [#allocation2]   ;;  %s688_s0 = inlined_call_operand.vmem [shape: f32[2,16,256], index: 0, kind: input, shape index: {}]   ;;  %s689_s1 = inlined_call_operand.vmem [shape: f32[2,16,32], index: 1, kind: input, shape index: {}]   ;;  %s690_s2 = inlined_call_operand.hbm [shape: f32[256,256], index: 2, kind: input, shape index: {}]   ;;  %s691_s3 = inlined_call_operand.vmem [shape: f32[32,32], index: 3, kind: input, shape index: {}]   ;;  %s692_s4 = inlined_call_operand.vmem [shape: f32[2,4,16,256], index: 4, kind: input, shape index: {}, may-alias: {4,6}]   ;;  %s693_s5 = inlined_call_operand.vmem [shape: f32[2,4,16,32], index: 5, kind: input, shape index: {}, may-alias: {5,7}]   ;;  %s694_s6 = inlined_call_operand.vmem [shape: f32[2,4,16,256], index: 6, kind: output, shape index: {0}, may-alias: {4,6}]   ;;  %s695_s7 = inlined_call_operand.vmem [shape: f32[2,4,16,32], index: 7, kind: output, shape index: {1}, may-alias: {5,7}]  }
   0x1   :  { %s23_s25 = sshll.u32 %s550_s24, 4  ;;  %s24_s25 = int_to_ptr.vmem [resolvable:$true] %s23_s25 }
   0x2   :  { %s536_s26 = scalar_lea.vmem %s24_s25, 8192  ;;  %p541_p1 = scmp.lt.s32.totalorder %s24_s25, %s24_s25 }
   0x3   :  { %p537_p0 = scmp.ne.s32.totalorder %s24_s25, %s536_s26  ;;  %p542_p2 = scmp.lt.s32.totalorder %s536_s26, %s536_s26 }
   0x5   :  { %p543_p3 = por %p542_p2, %p541_p1 }
   0x7   :  { %p544_p4 = pnand %p543_p3, %p537_p0 }
   0x9   :  { %547 = shalt.err (!%p544_p4)
}
   0xa   :  { %s551_s4 = smov 256   ;;  %s552_s27 = smov 16  }
   0xb   :  { %29 = dma.hbm_to_vmem [thread:$0]  %s690_s2, 8192, %s24_s25, [#allocation3], %s551_s4, %s551_s4, %s552_s27  }
   0xc   :  { %548 = dma.done.wait [#allocation3], 8192  }
   0xd   :  { %549 = vsyncadd [#allocation3], 4294959104  ;;  %v162_v0 = vld [vmem:[#allocation2 + $0xf8] sm:$0xff]  ;;  %v161_v1 = vld [vmem:[#allocation2 + $0xf0] sm:$0xff]  ;;  %vm288_vm0 = vcmask 261120  }
   0xe   :  { %v160_v2 = vld [vmem:[#allocation2 + $0xe8] sm:$0xff]  ;;  %195 = vmatprep.subr.mxu0 %v162_v0  ;;  %v159_v3 = vld [vmem:[#allocation2 + $0xe0] sm:$0xff]  ;;  %v158_v4 = vld [vmem:[#allocation2 + $0xd8] sm:$0xff] }
   0xf   :  { %196 = vmatpush1.msra.mxu0 %v161_v1  ;;  %v157_v5 = vld [vmem:[#allocation2 + $0xd0] sm:$0xff]  ;;  %v156_v6 = vld [vmem:[#allocation2 + $0xc8] sm:$0xff]  ;;  %v155_v7 = vld [vmem:[#allocation2 + $0xc0] sm:$0xff] }
  0x10   :  { %197 = vmatprep.subr.mxu0 %v160_v2  ;;  %v154_v8 = vld [vmem:[#allocation2 + $0xb8] sm:$0xff]  ;;  %v153_v9 = vld [vmem:[#allocation2 + $0xb0] sm:$0xff]  ;;  %v152_v10 = vld [vmem:[#allocation2 + $0xa8] sm:$0xff] }
  0x11   :  { %198 = vmatpush1.msra.mxu0 %v159_v3  ;;  %v151_v11 = vld [vmem:[#allocation2 + $0xa0] sm:$0xff]  ;;  %v150_v12 = vld [vmem:[#allocation2 + $0x98] sm:$0xff]  ;;  %v149_v13 = vld [vmem:[#allocation2 + $0x90] sm:$0xff] }
  0x12   :  { %199 = vmatprep.subr.mxu0 %v158_v4  ;;  %v148_v14 = vld [vmem:[#allocation2 + $0x88] sm:$0xff]  ;;  %v147_v15 = vld [vmem:[#allocation2 + $0x80] sm:$0xff]  ;;  %v146_v16 = vld [vmem:[#allocation2 + $0x78] sm:$0xff] }
  0x13   :  { %200 = vmatpush1.msra.mxu0 %v157_v5  ;;  %v145_v17 = vld [vmem:[#allocation2 + $0x70] sm:$0xff]  ;;  %v144_v18 = vld [vmem:[#allocation2 + $0x68] sm:$0xff]  ;;  %v143_v19 = vld [vmem:[#allocation2 + $0x60] sm:$0xff] }
  0x14   :  { %201 = vmatprep.subr.mxu0 %v156_v6  ;;  %v142_v20 = vld [vmem:[#allocation2 + $0x58] sm:$0xff]  ;;  %v141_v22 = vld [vmem:[#allocation2 + $0x50] sm:$0xff]  ;;  %v140_v24 = vld [vmem:[#allocation2 + $0x48] sm:$0xff] }
  0x15   :  { %202 = vmatpush1.msra.mxu0 %v155_v7  ;;  %v287_v21 = vld [vmem:[%s691_s3 + $0x18] sm:$0xff]  ;;  %v286_v23 = vld [vmem:[%s691_s3 + $0x10] sm:$0xff]  ;;  %v285_v25 = vld [vmem:[%s691_s3 + $0x8] sm:$0xff] }
  0x16   :  { %203 = vmatprep.subr.mxu0 %v154_v8  ;;  %511 = vmatprep.subr.mxu1 %v287_v21  ;;  %v139_v26 = vld [vmem:[#allocation2 + $0x40] sm:$0xff]  ;;  %v138_v27 = vld [vmem:[#allocation2 + $0x38] sm:$0xff]  ;;  %v137_v29 = vld [vmem:[#allocation2 + $0x30] sm:$0xff] }
  0x17   :  { %204 = vmatpush1.msra.mxu0 %v153_v9  ;;  %512 = vmatpush3.msra.mxu1 %v287_v21  ;;  %v284_v28 = vld [vmem:[%s691_s3] sm:$0xff]  ;;  %v136_v30 = vld [vmem:[#allocation2 + $0x28] sm:$0xff]  ;;  %v134_v34 = vld [vmem:[#allocation2 + $0x18] sm:$0xff] }
  0x18   :  { %205 = vmatprep.subr.mxu0 %v152_v10  ;;  %513 = vmatprep.subr.mxu1 %v286_v23  ;;  %v127_v31 = vld [vmem:[%s689_s1] sm:$0xff]  ;;  %v128_v33 = vld [vmem:[%s689_s1 + $0x8] sm:$0xff]  ;;  %v133_v36 = vld [vmem:[#allocation2 + $0x10] sm:$0xff] }
  0x19   :  { %206 = vmatpush1.msra.mxu0 %v151_v11  ;;  %514 = vmatpush3.msra.mxu1 %v286_v23  ;;  %v135_v32 = vld [vmem:[#allocation2 + $0x20] sm:$0xff]  ;;  %v120_v35 = vld [vmem:[%s688_s0 + $0x8] sm:$0xff]  ;;  %v129_v37 = vld [vmem:[%s689_s1 + $0x10] sm:$0xff] }
  0x1a   :  { %207 = vmatprep.subr.mxu0 %v150_v12  ;;  %515 = vmatprep.subr.mxu1 %v285_v25  ;;  %v132_v38 = vld [vmem:[#allocation2 + $0x8] sm:$0xff]  ;;  %v131_v39 = vld [vmem:[#allocation2] sm:$0xff]  ;;  %v130_v40 = vld [vmem:[%s689_s1 + $0x18] sm:$0xff] }
  0x1b   :  { %208 = vmatpush1.msra.mxu0 %v149_v13  ;;  %516 = vmatpush3.msra.mxu1 %v285_v25  ;;  %v194_v41 = vld [vmem:[#allocation2 + $0x1f8] sm:$0xff]  ;;  %v193_v42 = vld [vmem:[#allocation2 + $0x1f0] sm:$0xff]  ;;  %v192_v43 = vld [vmem:[#allocation2 + $0x1e8] sm:$0xff] }
  0x1c   :  { %209 = vmatprep.subr.mxu0 %v148_v14  ;;  %517 = vmatprep.subr.mxu1 %v284_v28  ;;  %v191_v44 = vld [vmem:[#allocation2 + $0x1e0] sm:$0xff]  ;;  %v190_v45 = vld [vmem:[#allocation2 + $0x1d8] sm:$0xff]  ;;  %v189_v46 = vld [vmem:[#allocation2 + $0x1d0] sm:$0xff] }
  0x1d   :  { %210 = vmatpush1.msra.mxu0 %v147_v15  ;;  %518 = vmatpush3.msra.mxu1 %v284_v28  ;;  %v188_v47 = vld [vmem:[#allocation2 + $0x1c8] sm:$0xff]  ;;  %v187_v48 = vld [vmem:[#allocation2 + $0x1c0] sm:$0xff]  ;;  %v186_v49 = vld [vmem:[#allocation2 + $0x1b8] sm:$0xff] }
  0x1e   :  { %211 = vmatprep.subr.mxu0 %v146_v16  ;;  %519 = vmatprep.mubr.msk.f32.mxu1 %vm288_vm0, %v127_v31  ;;  %v185_v50 = vld [vmem:[#allocation2 + $0x1b0] sm:$0xff]  ;;  %v184_v51 = vld [vmem:[#allocation2 + $0x1a8] sm:$0xff]  ;;  %v183_v52 = vld [vmem:[#allocation2 + $0x1a0] sm:$0xff] }
  0x1f   :  { %212 = vmatpush1.msra.mxu0 %v145_v17  ;;  %520 = vmatmul.mubr.msk.f32.vlgmr.msra.gmra.mxu1 %vm288_vm0, %v128_v33  ;;  %v182_v53 = vld [vmem:[#allocation2 + $0x198] sm:$0xff]  ;;  %v181_v54 = vld [vmem:[#allocation2 + $0x190] sm:$0xff]  ;;  %v180_v55 = vld [vmem:[#allocation2 + $0x188] sm:$0xff] }
  0x20   :  { %213 = vmatprep.subr.mxu0 %v144_v18  ;;  %259 = vmatprep.mubr.f32.mxu0 %v120_v35  ;;  %v179_v56 = vld [vmem:[#allocation2 + $0x180] sm:$0xff]  ;;  %v178_v57 = vld [vmem:[#allocation2 + $0x178] sm:$0xff]  ;;  %v177_v58 = vld [vmem:[#allocation2 + $0x170] sm:$0xff] }
  0x21   :  { %214 = vmatpush1.msra.mxu0 %v143_v19  ;;  %522 = vmatprep.mubr.msk.f32.mxu1 %vm288_vm0, %v129_v37  ;;  %v176_v59 = vld [vmem:[#allocation2 + $0x168] sm:$0xff]  ;;  %v175_v60 = vld [vmem:[#allocation2 + $0x160] sm:$0xff]  ;;  %v174_v61 = vld [vmem:[#allocation2 + $0x158] sm:$0xff] }
  0x22   :  { %215 = vmatprep.subr.mxu0 %v142_v20  ;;  %v173_v62 = vld [vmem:[#allocation2 + $0x150] sm:$0xff]  ;;  %v172_v63 = vld [vmem:[#allocation2 + $0x148] sm:$0xff]  ;;  %v171_v0 = vld [vmem:[#allocation2 + $0x140] sm:$0xff] }
  0x23   :  { %216 = vmatpush1.msra.mxu0 %v141_v22  ;;  %523 = vmatmul.mubr.msk.f32.gmra.mxu1 %vm288_vm0, %v130_v40  ;;  %v170_v1 = vld [vmem:[#allocation2 + $0x138] sm:$0xff]  ;;  %v169_v2 = vld [vmem:[#allocation2 + $0x130] sm:$0xff]  ;;  %v168_v3 = vld [vmem:[#allocation2 + $0x128] sm:$0xff] }
  0x24   :  { %217 = vmatprep.subr.mxu0 %v140_v24  ;;  %v167_v4 = vld [vmem:[#allocation2 + $0x120] sm:$0xff]  ;;  %v166_v5 = vld [vmem:[#allocation2 + $0x118] sm:$0xff]  ;;  %v165_v6 = vld [vmem:[#allocation2 + $0x110] sm:$0xff] }
  0x25   :  { %218 = vmatpush1.msra.mxu0 %v139_v26  ;;  %v164_v7 = vld [vmem:[#allocation2 + $0x108] sm:$0xff]  ;;  %v163_v8 = vld [vmem:[#allocation2 + $0x100] sm:$0xff]  ;;  %v122_v10 = vld [vmem:[%s688_s0 + $0x18] sm:$0xff] }
  0x26   :  { %219 = vmatprep.subr.mxu0 %v138_v27  ;;  %v119_v9 = vld [vmem:[%s688_s0] sm:$0xff]  ;;  %v121_v11 = vld [vmem:[%s688_s0 + $0x10] sm:$0xff]  ;;  %v124_v12 = vld [vmem:[%s688_s0 + $0x28] sm:$0xff] }
  0x27   :  { %220 = vmatpush1.msra.mxu0 %v137_v29  ;;  %v123_v13 = vld [vmem:[%s688_s0 + $0x20] sm:$0xff]  ;;  %v126_v14 = vld [vmem:[%s688_s0 + $0x38] sm:$0xff]  ;;  %v125_v15 = vld [vmem:[%s688_s0 + $0x30] sm:$0xff] }
  0x28   :  { %221 = vmatprep.subr.mxu0 %v136_v30 }
  0x29   :  { %222 = vmatpush1.msra.mxu0 %v135_v32 }
  0x2a   :  { %223 = vmatprep.subr.mxu0 %v134_v34 }
  0x2b   :  { %224 = vmatpush1.msra.mxu0 %v133_v36 }
  0x2c   :  { %225 = vmatprep.subr.mxu0 %v132_v38 }
  0x2d   :  { %226 = vmatpush1.msra.mxu0 %v131_v39 }
  0x2e   :  { %227 = vmatprep.subr.mxu0 %v194_v41 }
  0x2f   :  { %228 = vmatpush2.msra.mxu0 %v193_v42 }
  0x30   :  { %229 = vmatprep.subr.mxu0 %v192_v43 }
  0x31   :  { %230 = vmatpush2.msra.mxu0 %v191_v44 }
  0x32   :  { %231 = vmatprep.subr.mxu0 %v190_v45 }
  0x33   :  { %232 = vmatpush2.msra.mxu0 %v189_v46 }
  0x34   :  { %233 = vmatprep.subr.mxu0 %v188_v47 }
  0x35   :  { %234 = vmatpush2.msra.mxu0 %v187_v48 }
  0x36   :  { %235 = vmatprep.subr.mxu0 %v186_v49 }
  0x37   :  { %236 = vmatpush2.msra.mxu0 %v185_v50 }
  0x38   :  { %237 = vmatprep.subr.mxu0 %v184_v51 }
  0x39   :  { %238 = vmatpush2.msra.mxu0 %v183_v52 }
  0x3a   :  { %239 = vmatprep.subr.mxu0 %v182_v53 }
  0x3b   :  { %240 = vmatpush2.msra.mxu0 %v181_v54 }
  0x3c   :  { %241 = vmatprep.subr.mxu0 %v180_v55 }
  0x3d   :  { %242 = vmatpush2.msra.mxu0 %v179_v56 }
  0x3e   :  { %243 = vmatprep.subr.mxu0 %v178_v57 }
  0x3f   :  { %244 = vmatpush2.msra.mxu0 %v177_v58 }
  0x40   :  { %245 = vmatprep.subr.mxu0 %v176_v59 }
  0x41   :  { %246 = vmatpush2.msra.mxu0 %v175_v60 }
  0x42   :  { %247 = vmatprep.subr.mxu0 %v174_v61 }
  0x43   :  { %248 = vmatpush2.msra.mxu0 %v173_v62 }
  0x44   :  { %249 = vmatprep.subr.mxu0 %v172_v63 }
  0x45   :  { %250 = vmatpush2.msra.mxu0 %v171_v0 }
  0x46   :  { %251 = vmatprep.subr.mxu0 %v170_v1 }
  0x47   :  { %252 = vmatpush2.msra.mxu0 %v169_v2 }
  0x48   :  { %253 = vmatprep.subr.mxu0 %v168_v3 }
  0x49   :  { %254 = vmatpush2.msra.mxu0 %v167_v4 }
  0x4a   :  { %255 = vmatprep.subr.mxu0 %v166_v5 }
  0x4b   :  { %256 = vmatpush2.msra.mxu0 %v165_v6 }
  0x4c   :  { %257 = vmatprep.subr.mxu0 %v164_v7 }
  0x4d   :  { %258 = vmatpush2.msra.mxu0 %v163_v8 }
  0x4e   :  { %260 = vmatmul.mubr.f32.vlgmr.msra.gmra.mxu0 %v119_v9 }
  0x4f   :  { %265 = vmatprep.mubr.f32.mxu0 %v122_v10 }
  0x52   :  { %266 = vmatmul.mubr.f32.gmra.mxu0 %v121_v11 }
  0x53   :  { %271 = vmatprep.mubr.f32.mxu0 %v124_v12 }
  0x56   :  { %272 = vmatmul.mubr.f32.gmra.mxu0 %v123_v13 }
  0x57   :  { %277 = vmatprep.mubr.f32.mxu0 %v126_v14 }
  0x5a   :  { %278 = vmatmul.mubr.f32.gmra.mxu0 %v125_v15 }
  0xdf   :  { %v521_v16 = vpop.f32.mrf.mxu1 }
  0xe0   :  { %395 = vst.msk [vmem:[#allocation7 + $0x8] sm:$0xff] %vm288_vm0, %v521_v16 }
  0xe1   :  { %v367_v17 = vpop.f32.mrf.mxu1 }
  0xe2   :  { %394 = vst.msk [vmem:[#allocation7] sm:$0xff] %vm288_vm0, %v367_v17 }
  0xe3   :  { %v524_v18 = vpop.f32.mrf.mxu1 }
  0xe4   :  { %397 = vst.msk [vmem:[#allocation7 + $0x18] sm:$0xff] %vm288_vm0, %v524_v18 }
  0xe5   :  { %v377_v19 = vpop.f32.mrf.mxu1 }
  0xe6   :  { %396 = vst.msk [vmem:[#allocation7 + $0x10] sm:$0xff] %vm288_vm0, %v377_v19 }
  0xe7   :  { %v469_v20 = vld [vmem:[#allocation7 + $0x8] sm:$0xff] }
  0xe8   :  { %470 = vst [vmem:[%s695_s7 + $0x8] sm:$0xff] %v469_v20 }
  0xe9   :  { %v467_v21 = vld [vmem:[#allocation7] sm:$0xff] }
  0xea   :  { %468 = vst [vmem:[%s695_s7] sm:$0xff] %v467_v21 }
  0xeb   :  { %v473_v22 = vld [vmem:[#allocation7 + $0x18] sm:$0xff] }
  0xec   :  { %474 = vst [vmem:[%s695_s7 + $0x48] sm:$0xff] %v473_v22 }
  0xed   :  { %v471_v23 = vld [vmem:[#allocation7 + $0x10] sm:$0xff] }
  0xee   :  { %472 = vst [vmem:[%s695_s7 + $0x40] sm:$0xff] %v471_v23 }
 0x10e   :  { %v261_v24 = vpop.f32.mrf.mxu0 }
 0x10f   :  { %413 = vst [vmem:[%s694_s6] sm:$0xff] %v261_v24 }
 0x110   :  { %v263_v25 = vpop.f32.mrf.mxu0 }
 0x111   :  { %415 = vst [vmem:[%s694_s6 + $0x8] sm:$0xff] %v263_v25 }
 0x112   :  { %v267_v26 = vpop.f32.mrf.mxu0 }
 0x113   :  { %417 = vst [vmem:[%s694_s6 + $0x10] sm:$0xff] %v267_v26 }
 0x114   :  { %v269_v27 = vpop.f32.mrf.mxu0 }
 0x115   :  { %419 = vst [vmem:[%s694_s6 + $0x18] sm:$0xff] %v269_v27 }
 0x116   :  { %v273_v28 = vpop.f32.mrf.mxu0 }
 0x117   :  { %421 = vst [vmem:[%s694_s6 + $0x80] sm:$0xff] %v273_v28 }
 0x118   :  { %v275_v29 = vpop.f32.mrf.mxu0 }
 0x119   :  { %423 = vst [vmem:[%s694_s6 + $0x88] sm:$0xff] %v275_v29 }
 0x11a   :  { %v279_v30 = vpop.f32.mrf.mxu0 }
 0x11b   :  { %425 = vst [vmem:[%s694_s6 + $0x90] sm:$0xff] %v279_v30 }
 0x11c   :  { %v281_v31 = vpop.f32.mrf.mxu0 }
 0x11d   :  { %427 = vst [vmem:[%s694_s6 + $0x98] sm:$0xff] %v281_v31 }
 0x11e   :  { %482 = vsyncpa [#allocation3], 1 }

</bundles_post_ra>
